<compile_context>
chip_gen: v7x
topology: tpu7x:2x2x1
jax: 0.10.0
libtpu: 0.0.40
codegen_flags: <defaults>
</compile_context>

<pallas_src>
import jax
import jax.numpy as jnp
from jax.experimental import pallas as pl
from jax.experimental.pallas import tpu as pltpu


def se_kernel(x_ref, w1_ref, b1_ref, w2_ref, b2_ref, o_ref):
    """Fused SE block for a tile of TB samples.

    x_ref : [TB, C, HW]  activations (channels on sublanes, spatial on lanes)
    w1_ref: [Ch, C]      fc1 weight (PyTorch [out, in] layout)
    b1_ref: [Ch, 1]      fc1 bias (column)
    w2_ref: [C, Ch]      fc2 weight
    b2_ref: [C, 1]       fc2 bias (column)
    o_ref : [TB, C, HW]  output
    """
    tb, c, hw = x_ref.shape
    inv_hw = jnp.float32(1.0 / hw)

    # --- Global average pool per sample (keepdims reduce over the lane axis),
    # packed into a [C, TB] matrix so the MLP runs once per tile. The f32
    # upcast is consumed immediately by the reduce (no long-lived f32 slab).
    lane_ids = jax.lax.broadcasted_iota(jnp.int32, (c, tb), 1)
    pooled = jnp.zeros((c, tb), jnp.float32)
    for i in range(tb):
        col = jnp.sum(x_ref[i].astype(jnp.float32), axis=1, keepdims=True)  # [C, 1]
        pooled = jnp.where(lane_ids == i, col, pooled)
    pooled = pooled * inv_hw                                                # [C, TB]

    # --- Squeeze-excite MLP, batched over the tile, all in f32, weights in
    # native [out, in] layout (no in-kernel transposes). ---
    h = jnp.dot(w1_ref[...], pooled,
                preferred_element_type=jnp.float32) + b1_ref[...]           # [Ch, TB]
    h = jnp.maximum(h, 0.0)                                                 # ReLU
    s = jnp.dot(w2_ref[...], h,
                preferred_element_type=jnp.float32) + b2_ref[...]           # [C, TB]
    s = jax.nn.sigmoid(s)                                                   # Sigmoid

    # --- Channel-wise rescale of the lane-dense slab (the HBM-bound pass).
    # Re-read x_ref in its native dtype (bf16 stays bf16 on v6e/v7x); the
    # per-sample scale is a [C, 1] column broadcast over the HW lanes.
    for i in range(tb):
        scale = s[:, i:i + 1].astype(o_ref.dtype)                           # [C, 1]
        o_ref[i] = (x_ref[i] * scale).astype(o_ref.dtype)


def _vmem_limit_bytes():
    """Scoped-VMEM limit ~75% of physical (~96 MiB v5e/v6e, ~48 MiB v7x)."""
    cap = 64 * 1024 * 1024  # conservative fallback = v7x per-TC VMEM
    try:
        info = pltpu.get_tpu_info()
        for name in ("vmem_capacity_bytes", "vmem_size_bytes", "vmem_bytes"):
            val = getattr(info, name, None)
            if val:
                cap = int(val)
                break
    except Exception:
        pass
    return (3 * cap) // 4


def _pick_batch_tile(batch, per_sample_bytes, vmem_limit):
    """Samples per grid step: biggest tile whose double-buffered in+out copies
    fit the VMEM budget, >=2 grid steps for v7x's 2 TCs, unroll bounded."""
    headroom = 4 * 1024 * 1024                        # weights + f32 MLP temps
    budget = max(vmem_limit - headroom, 4 * per_sample_bytes)
    tb = budget // (4 * per_sample_bytes)             # 2x in + 2x out buffers
    tb = max(1, min(int(tb), int(batch), 64))         # 64 bounds static unroll
    if batch >= 2:
        tb = min(tb, (batch + 1) // 2)                # keep both v7x TCs busy
    return max(1, int(tb))


def se_layer(x_nchw, w1, b1, w2, b2):
    """SELayer forward. x_nchw: [B, C, H, W] (NCHW, matches PyTorch)."""
    B, C, H, W = x_nchw.shape
    Ch = w1.shape[0]                       # hidden = channel // reduction
    HW = H * W
    itemsize = jnp.dtype(x_nchw.dtype).itemsize

    vmem_limit = _vmem_limit_bytes()
    TB = _pick_batch_tile(B, C * HW * itemsize, vmem_limit)
    grid = (pl.cdiv(B, TB),)

    x2 = x_nchw.reshape(B, C, HW)          # free contiguous reshape (no copy)
    w1f = w1.astype(jnp.float32)           # [Ch, C]
    w2f = w2.astype(jnp.float32)           # [C, Ch]
    b1c = b1.reshape(Ch, 1).astype(jnp.float32)
    b2c = b2.reshape(C, 1).astype(jnp.float32)

    cost = pl.CostEstimate(
        flops=int(2 * B * C * HW + 4 * B * C * Ch),
        transcendentals=int(B * C),
        bytes_accessed=int(2 * B * C * HW * itemsize
                           + 4 * (w1f.size + w2f.size + b1c.size + b2c.size)),
    )

    out2 = pl.pallas_call(
        se_kernel,
        out_shape=jax.ShapeDtypeStruct((B, C, HW), x_nchw.dtype),
        grid_spec=pltpu.PrefetchScalarGridSpec(
            num_scalar_prefetch=0,
            grid=grid,
            in_specs=[
                pl.BlockSpec((TB, C, HW), lambda b: (b, 0, 0)),   # x batch tile
                pl.BlockSpec((Ch, C), lambda b: (0, 0)),          # fc1 weight
                pl.BlockSpec((Ch, 1), lambda b: (0, 0)),          # fc1 bias
                pl.BlockSpec((C, Ch), lambda b: (0, 0)),          # fc2 weight
                pl.BlockSpec((C, 1), lambda b: (0, 0)),           # fc2 bias
            ],
            out_specs=pl.BlockSpec((TB, C, HW), lambda b: (b, 0, 0)),
        ),
        compiler_params=pltpu.CompilerParams(
            dimension_semantics=("parallel",),
            vmem_limit_bytes=int(vmem_limit),
        ),
        cost_estimate=cost,
    )(x2, w1f, b1c, w2f, b2c)

    return out2.reshape(B, C, H, W)


def ref_se_layer(x, w1, b1, w2, b2):
    """Pure-JAX reference mirroring the PyTorch SELayer forward."""
    y = jnp.mean(x.astype(jnp.float32), axis=(2, 3))          # [B, C]
    h = jnp.maximum(y @ w1.T + b1, 0.0)                       # [B, Ch]
    s = jax.nn.sigmoid(h @ w2.T + b2)                         # [B, C]
    return x * s[:, :, None, None]


if __name__ == "__main__":
    # Shapes consistent with SELayer(channel=32, reduction=16) -> hidden=2.
    B, C, H, W = 2, 32, 16, 16
    reduction = 16
    Ch = C // reduction

    key = jax.random.PRNGKey(0)
    kx, k1, k2, k3, k4 = jax.random.split(key, 5)

    x = jax.random.normal(kx, (B, C, H, W), dtype=jnp.float32)

    # Linear init ~ PyTorch default: U(-1/sqrt(fan_in), 1/sqrt(fan_in)).
    lim1 = 1.0 / (C ** 0.5)
    w1 = jax.random.uniform(k1, (Ch, C), jnp.float32, -lim1, lim1)
    b1 = jax.random.uniform(k2, (Ch,), jnp.float32, -lim1, lim1)
    lim2 = 1.0 / (Ch ** 0.5)
    w2 = jax.random.uniform(k3, (C, Ch), jnp.float32, -lim2, lim2)
    b2 = jax.random.uniform(k4, (C,), jnp.float32, -lim2, lim2)

    out = se_layer(x, w1, b1, w2, b2)
    out = jax.block_until_ready(out)

    ref = ref_se_layer(x, w1, b1, w2, b2)
    assert out.shape == (B, C, H, W)
    assert jnp.allclose(out, ref, atol=1e-5, rtol=1e-5), "mismatch vs reference"

    print("KERNEL_OK")
</pallas_src>

<mosaic_0001>
module attributes {stable_mosaic.version = 11 : i64} {
  func.func @se_kernel(%arg0: i32, %arg1: memref<1x32x256xf32, #tpu.memory_space<vmem>>, %arg2: memref<2x32xf32, #tpu.memory_space<vmem>>, %arg3: memref<2x1xf32, #tpu.memory_space<vmem>>, %arg4: memref<32x2xf32, #tpu.memory_space<vmem>>, %arg5: memref<32x1xf32, #tpu.memory_space<vmem>>, %arg6: memref<1x32x256xf32, #tpu.memory_space<vmem>>) attributes {dimension_semantics = [#tpu.dimension_semantics<parallel>], iteration_bounds = array<i64: 2>, scalar_prefetch = 0 : i64, scratch_operands = 0 : i64, tpu.core_type = #tpu.core_type<tc>, window_params = [{transform_indices = @transform_0, window_bounds = array<i64: 1, 32, 256>}, {pipeline_mode = #tpu.pipeline_mode<synchronous>, transform_indices = @transform_1, window_bounds = array<i64: 2, 32>}, {pipeline_mode = #tpu.pipeline_mode<synchronous>, transform_indices = @transform_2, window_bounds = array<i64: 2, 1>}, {pipeline_mode = #tpu.pipeline_mode<synchronous>, transform_indices = @transform_3, window_bounds = array<i64: 32, 2>}, {pipeline_mode = #tpu.pipeline_mode<synchronous>, transform_indices = @transform_4, window_bounds = array<i64: 32, 1>}, {transform_indices = @transform_5, window_bounds = array<i64: 1, 32, 256>}]} {
    %0 = tpu.iota {dimensions = array<i32: 1>} : vector<32x1xi32>
    %cst = arith.constant 0.000000e+00 : f32
    %1 = vector.broadcast %cst : f32 to vector<32x1xf32>
    %c0 = arith.constant 0 : index
    %c0_0 = arith.constant 0 : index
    %c0_1 = arith.constant 0 : index
    %2 = vector.load %arg1[%c0, %c0_0, %c0_1] : memref<1x32x256xf32, #tpu.memory_space<vmem>>, vector<1x32x256xf32>
    %3 = vector.shape_cast %2 : vector<1x32x256xf32> to vector<32x256xf32>
    %cst_2 = arith.constant dense<0.000000e+00> : vector<32xf32>
    %4 = vector.multi_reduction <add>, %3, %cst_2 [1] : vector<32x256xf32> to vector<32xf32>
    %5 = vector.shape_cast %4 : vector<32xf32> to vector<32x1xf32>
    %c0_i32 = arith.constant 0 : i32
    %6 = vector.broadcast %c0_i32 : i32 to vector<32x1xi32>
    %7 = arith.cmpi eq, %0, %6 : vector<32x1xi32>
    %8 = arith.select %7, %5, %1 : vector<32x1xi1>, vector<32x1xf32>
    %cst_3 = arith.constant 3.906250e-03 : f32
    %9 = vector.broadcast %cst_3 : f32 to vector<32x1xf32>
    %10 = arith.mulf %8, %9 : vector<32x1xf32>
    %c0_4 = arith.constant 0 : index
    %c0_5 = arith.constant 0 : index
    %11 = vector.load %arg2[%c0_4, %c0_5] : memref<2x32xf32, #tpu.memory_space<vmem>>, vector<2x32xf32>
    %cst_6 = arith.constant dense<0.000000e+00> : vector<2x1xf32>
    %12 = tpu.matmul %11, %10, %cst_6 {dimension_numbers = #tpu.dot_dimension_numbers<[1], [0], [0], [1], [0, 0, 1, 1], [], []>} : vector<2x32xf32>, vector<32x1xf32>, vector<2x1xf32> -> vector<2x1xf32>
    %c0_7 = arith.constant 0 : index
    %c0_8 = arith.constant 0 : index
    %13 = vector.load %arg3[%c0_7, %c0_8] : memref<2x1xf32, #tpu.memory_space<vmem>>, vector<2x1xf32>
    %14 = arith.addf %12, %13 : vector<2x1xf32>
    %cst_9 = arith.constant 0.000000e+00 : f32
    %15 = vector.broadcast %cst_9 : f32 to vector<2x1xf32>
    %16 = arith.maximumf %14, %15 : vector<2x1xf32>
    %c0_10 = arith.constant 0 : index
    %c0_11 = arith.constant 0 : index
    %17 = vector.load %arg4[%c0_10, %c0_11] : memref<32x2xf32, #tpu.memory_space<vmem>>, vector<32x2xf32>
    %cst_12 = arith.constant dense<0.000000e+00> : vector<32x1xf32>
    %18 = tpu.matmul %17, %16, %cst_12 {dimension_numbers = #tpu.dot_dimension_numbers<[1], [0], [0], [1], [0, 0, 1, 1], [], []>} : vector<32x2xf32>, vector<2x1xf32>, vector<32x1xf32> -> vector<32x1xf32>
    %c0_13 = arith.constant 0 : index
    %c0_14 = arith.constant 0 : index
    %19 = vector.load %arg5[%c0_13, %c0_14] : memref<32x1xf32, #tpu.memory_space<vmem>>, vector<32x1xf32>
    %20 = arith.addf %18, %19 : vector<32x1xf32>
    %21 = arith.negf %20 : vector<32x1xf32>
    %22 = math.exp %21 : vector<32x1xf32>
    %cst_15 = arith.constant 1.000000e+00 : f32
    %23 = vector.broadcast %cst_15 : f32 to vector<32x1xf32>
    %24 = arith.addf %23, %22 : vector<32x1xf32>
    %25 = arith.divf %23, %24 : vector<32x1xf32>
    %c0_16 = arith.constant 0 : index
    %c0_17 = arith.constant 0 : index
    %c0_18 = arith.constant 0 : index
    %26 = vector.load %arg1[%c0_16, %c0_17, %c0_18] : memref<1x32x256xf32, #tpu.memory_space<vmem>>, vector<1x32x256xf32>
    %27 = vector.shape_cast %26 : vector<1x32x256xf32> to vector<32x256xf32>
    %28 = vector.broadcast %25 : vector<32x1xf32> to vector<32x256xf32>
    %29 = arith.mulf %27, %28 : vector<32x256xf32>
    %c0_19 = arith.constant 0 : index
    %c0_20 = arith.constant 0 : index
    %c0_21 = arith.constant 0 : index
    %30 = vector.load %arg6[%c0_19, %c0_20, %c0_21] : memref<1x32x256xf32, #tpu.memory_space<vmem>>, vector<1x32x256xf32>
    %31 = vector.shape_cast %30 : vector<1x32x256xf32> to vector<32x256xf32>
    %32 = vector.shape_cast %29 : vector<32x256xf32> to vector<1x32x256xf32>
    tpu.vector_store %arg6[%c0_19, %c0_20, %c0_21], %32 {strides = array<i32>} : memref<1x32x256xf32, #tpu.memory_space<vmem>>, vector<1x32x256xf32>,
    return
  }
  func.func @transform_0(%arg0: i32) -> (i32, i32, i32) {
    %c0_i32 = arith.constant 0 : i32
    %c0_i32_0 = arith.constant 0 : i32
    %c0_i32_1 = arith.constant 0 : i32
    return %arg0, %c0_i32, %c0_i32_0 : i32, i32, i32
  }
  func.func @transform_1(%arg0: i32) -> (i32, i32) {
    %c0_i32 = arith.constant 0 : i32
    %c0_i32_0 = arith.constant 0 : i32
    %c0_i32_1 = arith.constant 0 : i32
    return %c0_i32, %c0_i32_0 : i32, i32
  }
  func.func @transform_2(%arg0: i32) -> (i32, i32) {
    %c0_i32 = arith.constant 0 : i32
    %c0_i32_0 = arith.constant 0 : i32
    %c0_i32_1 = arith.constant 0 : i32
    return %c0_i32, %c0_i32_0 : i32, i32
  }
  func.func @transform_3(%arg0: i32) -> (i32, i32) {
    %c0_i32 = arith.constant 0 : i32
    %c0_i32_0 = arith.constant 0 : i32
    %c0_i32_1 = arith.constant 0 : i32
    return %c0_i32, %c0_i32_0 : i32, i32
  }
  func.func @transform_4(%arg0: i32) -> (i32, i32) {
    %c0_i32 = arith.constant 0 : i32
    %c0_i32_0 = arith.constant 0 : i32
    %c0_i32_1 = arith.constant 0 : i32
    return %c0_i32, %c0_i32_0 : i32, i32
  }
  func.func @transform_5(%arg0: i32) -> (i32, i32, i32) {
    %c0_i32 = arith.constant 0 : i32
    %c0_i32_0 = arith.constant 0 : i32
    %c0_i32_1 = arith.constant 0 : i32
    return %arg0, %c0_i32, %c0_i32_0 : i32, i32, i32
  }
}

</mosaic_0001>

<bundles_post_ra>
// kernel: tpu_custom_call.1
= control target key start
LH: loop header
LB: loop body
LE: loop exit
PB: predicated region body
PF: predicated region fallthrough
CT: control target
= control target key end

     0   :  { %10 = vsyncpa [#allocation3], 0  ;;  %s1107_s0 = inlined_call_operand.hbm [shape: f32[2,32,256], index: 0, kind: input, shape index: {}]   ;;  %s1108_s1 = inlined_call_operand.vmem [shape: f32[2,32], index: 1, kind: input, shape index: {}]   ;;  %s1109_s2 = inlined_call_operand.vmem [shape: f32[2,1], index: 2, kind: input, shape index: {}]   ;;  %s1110_s3 = inlined_call_operand.vmem [shape: f32[32,2], index: 3, kind: input, shape index: {}]   ;;  %s1111_s4 = inlined_call_operand.vmem [shape: f32[32,1], index: 4, kind: input, shape index: {}]   ;;  %s1112_s5 = inlined_call_operand.hbm [shape: f32[2,32,256], index: 5, kind: output, shape index: {}]  }
   0x1   :  { %12 = vsyncpa [#allocation3 + $0x1], 0 }
   0x2   :  { %13 = vsyncpa [#allocation4], 0 }
   0x3   :  { %15 = vsyncpa [#allocation4 + $0x1], 0  ;;  %s879_s18 = smov 0   ;;  %s881_s19 = smov 0  }
   0x4   :  { %s883_s20 = smov 0   ;;  %s885_s21 = smov 0  }
   0x5 LB: > { %s900_s22 = sadd.s32 4294967295, %s837_s21   ;;  %s608_s23 = sadd.s32 4294967294, %s837_s21   ;;  %s837_s21 = sphi %s885_s21, %s1125_s21   ;;  %s833_s20 = sphi %s883_s20, %s1124_s20   ;;  %s829_s19 = sphi %s881_s19, %s1123_s19   ;;  %s825_s18 = sphi %s879_s18, %s1122_s18  }
   0x6   : > { %s904_s24 = sadd.s32 1, %s837_s21   ;;  %s28_s25 = sadd.s32 1, %s833_s20 }
   0x7   : > { %s25_s26 = ssub.s32 %s837_s21, %s904_s24  ;;  %p35_p0 = scmp.ne.s32.totalorder %s833_s20, %s829_s19 }
   0x8   : > { %p26_p1 = scmp.eq.s32.totalorder %s25_s26, 0  ;;  %p36_p2 = scmp.eq.s32.totalorder %s837_s21, 0 }
   0x9   : > { %p41_p3 = scmp.ne.s32.totalorder %s829_s19, %s825_s18  ;;  %p42_p4 = scmp.eq.s32.totalorder %s900_s22, 0 }
   0xa   : > { %s916_s27 = scalar_select %p26_p1, %s833_s20, %s28_s25  }
   0xb   : > { %p918_p5 = por %p36_p2, %p35_p0  ;;  %p922_p6 = por %p42_p4, %p41_p3 }
   0xc   : > { %p149_p7 = scmp.eq.s32.totalorder %s900_s22, 1  ;;  %p155_p8 = scmp.eq.s32.totalorder %s608_s23, 1 }
   0xd   : > { %p681_p10 = scmp.lt.s32.totalorder %s837_s21, 2  ;;  %s187_s7 = sand.u32 1, %s833_s20  }
   0xe   : > { %p929_p11 = por %p149_p7, %p35_p0  ;;  %p933_p12 = por %p155_p8, %p41_p3 }
   0xf   : > { %s632_s8 = sshll.u32 %s837_s21, 10  ;;  %s611_s9 = sshll.u32 %s187_s7, 6 }
  0x10   : > { %s1116_s30 = scalar_select %p929_p11, 1, 0 }
  0x11   : > { %s1117_s6 = scalar_select %p933_p12, 1, 0 }
  0x12   : > { %s942_s12 = scalar_lea.hbm %s1107_s0, %s632_s8  ;;  %s191_s13 = scalar_lea.vmem [#allocation2], %s611_s9 }
  0x13   : > { %s198_s14 = sshll.u32 %s191_s13, 4  ;;  %p946_p13 = pnand %p681_p10, %p918_p5  ;;  %s950_s14 = int_to_ptr.vmem [resolvable:$true] %s198_s14 }
  0x14   : > { %s952_s16 = scalar_lea.sflag [#allocation3], %s187_s7  ;;  %s741_s17 = scalar_lea.hbm %s942_s12, 1024 }
  0x15   : > { %p742_p0 = scmp.ne.s32.totalorder %s942_s12, %s741_s17  ;;  %p743_p1 = pneg %p946_p13 }
  0x16   : > { %s746_s26 = scalar_lea.hbm %s1107_s0, 2048  ;;  %p747_p4 = scmp.lt.u32.totalorder %s942_s12, %s1107_s0 }
  0x17   : > { %p744_p2 = pnand %p743_p1, %p742_p0  ;;  %p748_p5 = scmp.lt.u32.totalorder %s746_s26, %s741_s17 }
  0x18   : > { %p750_p8 = scmp.lt.u32.totalorder %s741_s17, %s942_s12 }
  0x19   : > { %p745_p3 = pneg %p744_p2  ;;  %p749_p7 = por %p748_p5, %p747_p4 }
  0x1b   : > { %p751_p10 = por %p750_p8, %p749_p7 }
  0x1d   : > { %p752_p9 = pnand %p751_p10, %p745_p3 }
  0x1f   : > { %755 = shalt.err (!%p752_p9)
}
  0x20   : > { %s756_s7 = scalar_lea.vmem %s950_s14, 1024  ;;  %s839_s9 = smov [#allocation2]  }
  0x21   : > { %p757_p0 = scmp.ne.s32.totalorder %s950_s14, %s756_s7  ;;  %s761_s10 = sshll.u32 %s839_s9, 4  ;;  %s762_s10 = int_to_ptr.vmem [resolvable:$false] %s761_s10 }
  0x22   : > { %s763_s11 = scalar_lea.vmem %s762_s10, 2048  ;;  %p764_p11 = scmp.lt.s32.totalorder %s950_s14, %s762_s10 }
  0x23   : > { %p759_p2 = pnand %p757_p0, %p743_p1  ;;  %p765_p4 = scmp.lt.s32.totalorder %s763_s11, %s756_s7 }
  0x25   : > { %p760_p12 = pneg %p759_p2  ;;  %p766_p5 = por %p765_p4, %p764_p11 }
  0x27   : > { %p767_p7 = pnand %p766_p5, %p760_p12 }
  0x29   : > { %770 = shalt.err (!%p767_p7)
}
  0x2a   : > { %s840_s13 = smov 256   ;;  %s841_s17 = smov 16  }
  0x2b   : > { %676 = dma.hbm_to_vmem [thread:$0]  (!%p946_p13), %s942_s12, 1024, %s950_s14, %s952_s16, %s840_s13, %s840_s13, %s841_s17  }
  0x2c   : > { %p614_p9 = scmp.ge.s32.totalorder %s837_s21, 1  ;;  %p206_p1 = scmp.lt.s32.totalorder %s837_s21, 3 }
  0x2e   : > { %p207_p3 = pnand %p614_p9, %p206_p1 }
  0x2f   : > { %s983_s23 = sand.u32 (!%p207_p3), 1, %s829_s19  }
  0x30   : > { %210 = sbr.rel (%p207_p3) target bundleno = 830 (0x33e), region = 40  ;;  %s615_s25 = sshll.u32 (!%p207_p3), %s983_s23, 6 }
  0x31   : > { %s213_s26 = scalar_lea.sflag (!%p207_p3), [#allocation3], %s983_s23  ;;  %s216_s28 = scalar_lea.vmem (!%p207_p3), [#allocation2], %s615_s25 }
  0x37   : > { %816 = dma.done.wait (%p922_p6), %s213_s26, 1024  }
  0x38   : > { %818 = vsyncadd (%p922_p6), %s213_s26, 4294966272  ;;  %v993_v0 = vld [vmem:[%s216_s28 + $0x20] sm:$0xff]  ;;  %v995_v1 = vld [vmem:[%s216_s28 + $0x28] sm:$0xff]  ;;  %v842_v12 = vmov 0.0|0.0   ;;  %vm843_vm0 = vmmov 0   ;;  %v844_v13 = vmov 0.0   ;;  %v243_v14 = vlaneseq }
  0x39   : > { %v997_v2 = vld [vmem:[%s216_s28] sm:$0xff]  ;;  %v259_v3 = vadd.f32 %v995_v1, %v993_v0  ;;  %v1001_v4 = vld [vmem:[%s216_s28 + $0x8] sm:$0xff]  ;;  %v1003_v5 = vld [vmem:[%s216_s28 + $0x30] sm:$0xff]  ;;  %663 = vmatprep.subr.bf16.mxu0 %v842_v12  ;;  %652 = vmatprep.mubr.msk.f32.mxu0 %vm843_vm0, %v844_v13  ;;  %vm276_vm2 = vcmask 261120   ;;  %vm359_vm3 = vcmask 15360   ;;  %vm372_vm4 = vcmask 1041408  }
  0x3a   : > { %v1005_v6 = vld [vmem:[%s216_s28 + $0x38] sm:$0xff]  ;;  %v253_v7 = vadd.f32 %v1001_v4, %v997_v2  ;;  %v1009_v8 = vld [vmem:[%s216_s28 + $0x10] sm:$0xff]  ;;  %v244_v15 = vand.u32 127, %v243_v14  ;;  %v274_v30 = vld [vmem:[%s1108_s1] sm:$0x3]  ;;  %v845_v40 = vmov 0  }
  0x3b   : > { %v1011_v9 = vld [vmem:[%s216_s28 + $0x18] sm:$0xff]  ;;  %260 = vadd.xlane.f32.xlu1 %v259_v3  ;;  %v262_v10 = vadd.f32 %v1005_v6, %v1003_v5  ;;  %v351_v31 = vld [vmem:[%s1110_s3] sm:$0xff]  ;;  %v352_v37 = vld [vmem:[%s1110_s3 + $0x8] sm:$0xff]  ;;  %723 = vset.pattern.permute.xlu0 %v845_v40  ;;  %s242_s7 = scalar_lea.vmem [#allocation5], %s615_s25  ;;  %s633_s10 = sshll.u32 %s900_s22, 10 }
  0x3c   : > { %254 = vadd.xlane.f32.xlu0 %v253_v7  ;;  %v256_v11 = vadd.f32 %v1011_v9, %v1009_v8  ;;  %vm265_vm1 = vcmp.eq.s32.totalorder %v244_v15, 0  ;;  %657 = vmatprep.mubr.msk.f32.mxu1 %vm359_vm3, %v351_v31  ;;  %v275_v32 = vld [vmem:[%s1109_s2] sm:$0x3]  ;;  %v353_v38 = vld [vmem:[%s1110_s3 + $0x10] sm:$0xff]  ;;  %v354_v39 = vld [vmem:[%s1110_s3 + $0x18] sm:$0xff]  ;;  %s535_s9 = sshll.u32 %s242_s7, 4  ;;  %s1061_s13 = scalar_lea.hbm %s1112_s5, %s633_s10  ;;  %s1056_s9 = int_to_ptr.vmem [resolvable:$true] %s535_s9 }
  0x3d   : > { %724 = vset.pattern.permute.xlu1 %v845_v40  ;;  %v356_v41 = vld [vmem:[%s1111_s4 + $0x8] sm:$0xff]  ;;  %v355_v42 = vld [vmem:[%s1111_s4] sm:$0xff]  ;;  %v358_v47 = vld [vmem:[%s1111_s4 + $0x18] sm:$0xff]  ;;  %s522_s22 = scalar_lea.sflag [#allocation4], %s983_s23  ;;  %s771_s17 = scalar_lea.vmem %s1056_s9, 1024 }
  0x3e   : > { %v357_v49 = vld [vmem:[%s1111_s4 + $0x10] sm:$0xff]  ;;  %p772_p6 = scmp.ne.s32.totalorder %s1056_s9, %s771_s17  ;;  %p1119_p11 = scmp.ne.s32.totalorder %s1116_s30, 0 }
  0x3f   : > { %263 = vadd.xlane.f32.xlu1 %v262_v10  ;;  %s846_s26 = smov [#allocation5]  }
  0x40   : > { %257 = vadd.xlane.f32.xlu0 %v256_v11  ;;  %p773_p12 = pnand %p772_p6, %p1119_p11  ;;  %s775_s28 = sshll.u32 %s846_s26, 4  ;;  %s776_s28 = int_to_ptr.vmem [resolvable:$false] %s775_s28 }
  0x41   : > { %s777_s29 = scalar_lea.vmem %s776_s28, 2048  ;;  %p778_p8 = scmp.lt.s32.totalorder %s1056_s9, %s776_s28 }
  0x42   : > { %p774_p13 = pneg %p773_p12  ;;  %p779_p10 = scmp.lt.s32.totalorder %s777_s29, %s771_s17 }
  0x44   : > { %p780_p0 = por %p779_p10, %p778_p8 }
  0x46   : > { %p781_p2 = pnand %p780_p0, %p774_p13 }
  0xc8   : > { %v261_v16 = vpop.xlane.xlu1 %260 }
  0xc9   : > { %v255_v17 = vpop.xlane.xlu0 %254  ;;  %v268_v21 = vsel %vm265_vm1, %v261_v16, 0.0 }
  0xca   : > { %v266_v18 = vsel %vm265_vm1, %v255_v17, 0.0  ;;  %v272_v26 = vmul.f32 0.00390625, %v268_v21 }
  0xcb   : > { %v270_v24 = vmul.f32 0.00390625, %v266_v18 }
  0xcc   : > { %v264_v19 = vpop.xlane.xlu1 %263 }
  0xcd   : > { %v258_v20 = vpop.xlane.xlu0 %257  ;;  %v269_v22 = vsel %vm265_vm1, %v264_v19, 0.0 }
  0xce   : > { %v267_v23 = vsel %vm265_vm1, %v258_v20, 0.0  ;;  %v273_v27 = vmul.f32 0.00390625, %v269_v22 }
  0xcf   : > { %v271_v25 = vmul.f32 0.00390625, %v267_v23 }
  0xd0   : > { %v667_v29 = vpack.c.bf16 %v273_v27, %v272_v26 }
  0xd1   : > { %v664_v28 = vpack.c.bf16 %v271_v25, %v270_v24 }
  0xd3   : > { %665 = vmatpush3.bf16.msra.mxu0 %v664_v28 }
  0xd4   : > { %666 = vmatprep.subr.bf16.mxu0 %v842_v12 }
  0xd7   : > { %668 = vmatpush3.bf16.msra.mxu0 %v667_v29 }
  0xda   : > { %653 = vmatmul.mubr.msk.f32.vlgmr.msra.gmra.mrb[0].mxu0 %vm276_vm2, %v274_v30 }
 0x1ad   : > { %v346_v33 = vpop.f32.mrb[0].mxu0 }
 0x1ae   : > { %v347_v34 = vadd.f32 %v346_v33, %v275_v32  ;;  %v654_v35 = vpop.f32.mrb[1].mxu0 }
 0x1b0   : > { %v350_v36 = vmax.f32 %v347_v34, 0.0 }
 0x1b2   : > { %655 = vmatprep.subr.msk.mxu1 %vm372_vm4, %v350_v36 }
 0x1b3   : > { %656 = vmatpush3.msk.msra.mxu1 %vm372_vm4, %v350_v36 }
 0x1b4   : > { %658 = vmatmul.mubr.msk.f32.vlgmr.msra.gmra.mrb[0].mxu1 %vm359_vm3, %v352_v37 }
 0x1b5   : > { %660 = vmatprep.mubr.msk.f32.mxu1 %vm359_vm3, %v353_v38 }
 0x1b8   : > { %661 = vmatmul.mubr.msk.f32.gmra.mrb[2].mxu1 %vm359_vm3, %v354_v39 }
 0x287   : > { %v659_v43 = vpop.f32.mrb[0].mxu1 }
 0x288   : > { %v448_v44 = vadd.f32 %v659_v43, %v356_v41  ;;  %v442_v45 = vpop.f32.mrb[1].mxu1 }
 0x289   : > { %v443_v46 = vadd.f32 %v442_v45, %v355_v42 }
 0x28a   : > { %v624_v48 = vmul.f32 -1.442695, %v448_v44 }
 0x28b   : > { %v623_v50 = vmul.f32 -1.442695, %v443_v46  ;;  %v662_v51 = vpop.f32.mrb[2].mxu1 }
 0x28c   : > { %725 = vpow2.f32 %v624_v48  ;;  %v458_v52 = vadd.f32 %v662_v51, %v358_v47  ;;  %v452_v53 = vpop.f32.mrb[3].mxu1 }
 0x28d   : > { %727 = vpow2.f32 %v623_v50  ;;  %v453_v54 = vadd.f32 %v452_v53, %v357_v49 }
 0x28e   : > { %v626_v55 = vmul.f32 -1.442695, %v458_v52 }
 0x28f   : > { %v625_v56 = vmul.f32 -1.442695, %v453_v54 }
 0x290   : > { %729 = vpow2.f32 %v626_v55 }
 0x291   : > { %731 = vpow2.f32 %v625_v56 }
 0x296   : > { %v726_v57 = vpop.eup %725 }
 0x297   : > { %v728_v58 = vpop.eup %727  ;;  %v474_v59 = vadd.f32 1.0, %v726_v57 }
 0x298   : > { %v473_v60 = vadd.f32 1.0, %v728_v58 }
 0x299   : > { %733 = vrcp.f32 %v474_v59 }
 0x29a   : > { %v730_v61 = vpop.eup %729  ;;  %735 = vrcp.f32 %v473_v60 }
 0x29b   : > { %v732_v62 = vpop.eup %731  ;;  %v476_v3 = vadd.f32 1.0, %v730_v61 }
 0x29c   : > { %v475_v63 = vadd.f32 1.0, %v732_v62 }
 0x29e   : > { %737 = vrcp.f32 %v475_v63 }
 0x29f   : > { %739 = vrcp.f32 %v476_v3 }
 0x2a3   : > { %v734_v7 = vpop.eup %733 }
 0x2a4   : > { %v736_v10 = vpop.eup %735  ;;  %492 = vperm.xlu1 %724, %v734_v7  }
 0x2a5   : > { %487 = vperm.xlu0 %723, %v736_v10  }
 0x2a8   : > { %v738_v11 = vpop.eup %737 }
 0x2a9   : > { %497 = vperm.xlu1 %724, %v738_v11   ;;  %v740_v12 = vpop.eup %739 }
 0x2ad   : > { %502 = vperm.xlu1 %724, %v740_v12  }
 0x323   : > { %v493_v13 = vpop.permute.xlu1 %492 }
 0x324   : > { %v507_v14 = vmul.f32 %v493_v13, %v1009_v8  ;;  %v508_v15 = vmul.f32 %v493_v13, %v1011_v9  ;;  %v488_v16 = vpop.permute.xlu0 %487 }
 0x325   : > { %v505_v17 = vmul.f32 %v488_v16, %v997_v2  ;;  %v506_v18 = vmul.f32 %v488_v16, %v1001_v4 }
 0x326   : > { %515 = vst [vmem:[%s242_s7 + $0x10] sm:$0xff] %v507_v14  ;;  %516 = vst [vmem:[%s242_s7 + $0x18] sm:$0xff] %v508_v15 }
 0x327   : > { %513 = vst [vmem:[%s242_s7] sm:$0xff] %v505_v17  ;;  %514 = vst [vmem:[%s242_s7 + $0x8] sm:$0xff] %v506_v18 }
 0x328   : > { %v498_v19 = vpop.permute.xlu1 %497 }
 0x329   : > { %v509_v20 = vmul.f32 %v498_v19, %v993_v0  ;;  %v510_v8 = vmul.f32 %v498_v19, %v995_v1 }
 0x32b   : > { %517 = vst [vmem:[%s242_s7 + $0x20] sm:$0xff] %v509_v20  ;;  %518 = vst [vmem:[%s242_s7 + $0x28] sm:$0xff] %v510_v8 }
 0x32c   : > { %v503_v2 = vpop.permute.xlu1 %502 }
 0x32d   : > { %v511_v4 = vmul.f32 %v503_v2, %v1003_v5  ;;  %v512_v0 = vmul.f32 %v503_v2, %v1005_v6 }
 0x32f   : > { %519 = vst [vmem:[%s242_s7 + $0x30] sm:$0xff] %v511_v4  ;;  %520 = vst [vmem:[%s242_s7 + $0x38] sm:$0xff] %v512_v0 }
 0x330   : > { %784 = shalt.err (!%p781_p2)
}
 0x331   : > { %s785_s12 = scalar_lea.hbm %s1061_s13, 1024  ;;  %s789_s16 = scalar_lea.hbm %s1112_s5, 2048 }
 0x332   : > { %p786_p4 = scmp.ne.s32.totalorder %s1061_s13, %s785_s12  ;;  %p790_p9 = scmp.lt.u32.totalorder %s1061_s13, %s1112_s5 }
 0x333   : > { %p791_p1 = scmp.lt.u32.totalorder %s789_s16, %s785_s12  ;;  %p793_p6 = scmp.lt.u32.totalorder %s785_s12, %s1061_s13 }
 0x334   : > { %p787_p5 = pnand %p786_p4, %p1119_p11 }
 0x335   : > { %p792_p3 = por %p791_p1, %p790_p9 }
 0x336   : > { %p788_p7 = pneg %p787_p5 }
 0x337   : > { %p794_p12 = por %p793_p6, %p792_p3 }
 0x339   : > { %p795_p13 = pnand %p794_p12, %p788_p7 }
 0x33b   : > { %798 = shalt.err (!%p795_p13)
}
 0x33c   : > { %s847_s10 = smov 256   ;;  %s848_s25 = smov 16  }
 0x33d   : > { %671 = dma.vmem_to_hbm [thread:$0]  (%p1119_p11), %s1056_s9, 1024, %s1061_s13, %s522_s22, %s847_s10, %s847_s10, %s848_s25  }
 0x33e PF: > { %s550_s11 = sand.u32 1, %s825_s18   ;;  %p1120_p8 = scmp.ne.s32.totalorder %s1117_s6, 0 }
 0x33f   : > { %p1121_p10 = scmp.ge.s32.totalorder %s837_s21, 2  ;;  %s551_s17 = scalar_lea.sflag [#allocation4], %s550_s11 }
 0x341   : > { %p678_p0 = pnand %p1121_p10, %p1120_p8 }
 0x343   : > { %820 = dma.done.wait (!%p678_p0), %s551_s17, 1024  }
 0x344   : > { %822 = vsyncadd (!%p678_p0), %s551_s17, 4294966272  ;;  %p18_p2 = scmp.ge.s32.totalorder %s904_s24, 4   ;;  %s1122_s18 = smov %s829_s19 }
 0x345   : > { %s1123_s19 = smov %s833_s20  ;;  %s1124_s20 = smov %s916_s27 }
 0x346   : > { %s1125_s21 = smov %s904_s24  ;;  %20 = sbr.rel (!%p18_p2) target bundleno = 5 (0x5), region = 85 }
 0x34d   :  { %556 = vsyncpa [#allocation3], 1 }
 0x34e   :  { %558 = vsyncpa [#allocation3 + $0x1], 1 }
 0x34f   :  { %559 = vsyncpa [#allocation4], 1 }
 0x350   :  { %561 = vsyncpa [#allocation4 + $0x1], 1 }

</bundles_post_ra>
